<compile_context>
chip_gen: v7x
topology: tpu7x:2x2x1
jax: 0.10.0
libtpu: 0.0.40
codegen_flags: <defaults>
</compile_context>

<pallas_src>
import jax
import jax.numpy as jnp
from jax import lax
from jax.experimental import pallas as pl
from jax.experimental.pallas import tpu as pltpu

C_PAD = 128          # lane-dense channel width used throughout the network
_BN_EPS = 1e-5

_COMPILER_PARAMS = pltpu.CompilerParams(
    dimension_semantics=("parallel",),        # 2 TensorCores on v7x
    vmem_limit_bytes=32 * 1024 * 1024,
)


# ----------------------------- Pallas kernels ------------------------------
# Activation layout inside every kernel: one image per grid step, spatially
# zero-padded by 1, channel-padded to 128 lanes, bf16:  (H+2, W+2, 128).
# Conv weights: (3, 3*128, 128) bf16 -- leading index is the kernel column j,
# the 3*128 rows are the three kernel rows (i = 0, 1, 2) stacked along input
# channels, with the folded BN scale (and rezero alpha) already applied.
# Bias: (1, 128) f32.


def _conv_rows(x0, x1, x2, w_ref, wout):
    """3x3 conv (stride 1 along W) for one output row.

    x0/x1/x2: (Wsrc, 128) bf16 input rows for kernel rows i = 0, 1, 2.
    Returns the f32 (wout, 128) pre-activation (bias not yet added).
    """
    xcat = jnp.concatenate([x0, x1, x2], axis=-1)            # (Wsrc, 384)
    acc = jnp.dot(xcat[0:wout, :], w_ref[0],
                  preferred_element_type=jnp.float32)
    acc = acc + jnp.dot(xcat[1:wout + 1, :], w_ref[1],
                        preferred_element_type=jnp.float32)
    acc = acc + jnp.dot(xcat[2:wout + 2, :], w_ref[2],
                        preferred_element_type=jnp.float32)
    return acc


def _conv1_kernel(xp_ref, w_ref, b_ref, o_ref):
    """conv1 + folded BN + ReLU.  Output stays spatially padded (border = 0)."""
    hp, wp, _ = xp_ref.shape
    h, w = hp - 2, wp - 2
    o_ref[...] = jnp.zeros(o_ref.shape, o_ref.dtype)

    def row(r, carry):
        acc = _conv_rows(xp_ref[r], xp_ref[r + 1], xp_ref[r + 2], w_ref, w)
        o_ref[r + 1, pl.ds(1, w), :] = jnp.maximum(
            acc + b_ref[...], 0.0).astype(o_ref.dtype)
        return carry

    lax.fori_loop(0, h, row, None)


def _block_id_kernel(xp_ref, wa_ref, ba_ref, wb_ref, bb_ref, o_ref, mid_ref):
    """Fused identity BasicBlock (stride 1, cin == planes).

    conv_a output lives only in the VMEM scratch `mid_ref` (kept spatially
    padded); conv_b + residual + ReLU run in the same kernel invocation.
    """
    hp, wp, _ = xp_ref.shape
    h, w = hp - 2, wp - 2
    mid_ref[...] = jnp.zeros(mid_ref.shape, mid_ref.dtype)
    o_ref[...] = jnp.zeros(o_ref.shape, o_ref.dtype)

    def a_row(r, carry):
        acc = _conv_rows(xp_ref[r], xp_ref[r + 1], xp_ref[r + 2], wa_ref, w)
        mid_ref[r + 1, pl.ds(1, w), :] = jnp.maximum(
            acc + ba_ref[...], 0.0).astype(mid_ref.dtype)
        return carry

    lax.fori_loop(0, h, a_row, None)

    def b_row(r, carry):
        acc = _conv_rows(mid_ref[r], mid_ref[r + 1], mid_ref[r + 2], wb_ref, w)
        res = xp_ref[r + 1, pl.ds(1, w), :].astype(jnp.float32)
        o_ref[r + 1, pl.ds(1, w), :] = jnp.maximum(
            acc + bb_ref[...] + res, 0.0).astype(o_ref.dtype)
        return carry

    lax.fori_loop(0, h, b_row, None)


def _block_down_kernel(pee_ref, peo_ref, poe_ref, poo_ref, sc_ref,
                       wa_ref, ba_ref, wb_ref, bb_ref, o_ref, mid_ref):
    """Fused downsampling BasicBlock (stride-2 conv_a + option-'A' shortcut).

    The stride-2 conv reads the four spatial-parity planes of the padded input
    so all slices are contiguous (no strided VMEM access inside the kernel).
    """
    ho = o_ref.shape[0] - 2
    wo = o_ref.shape[1] - 2
    mid_ref[...] = jnp.zeros(mid_ref.shape, mid_ref.dtype)
    o_ref[...] = jnp.zeros(o_ref.shape, o_ref.dtype)

    def a_row(r, carry):
        # kernel columns j = 0, 2 read even input columns; j = 1 reads odd ones
        xe = jnp.concatenate([pee_ref[r], poe_ref[r], pee_ref[r + 1]], axis=-1)
        xo = jnp.concatenate([peo_ref[r], poo_ref[r], peo_ref[r + 1]], axis=-1)
        acc = jnp.dot(xe[0:wo, :], wa_ref[0],
                      preferred_element_type=jnp.float32)
        acc = acc + jnp.dot(xo[0:wo, :], wa_ref[1],
                            preferred_element_type=jnp.float32)
        acc = acc + jnp.dot(xe[1:wo + 1, :], wa_ref[2],
                            preferred_element_type=jnp.float32)
        mid_ref[r + 1, pl.ds(1, wo), :] = jnp.maximum(
            acc + ba_ref[...], 0.0).astype(mid_ref.dtype)
        return carry

    lax.fori_loop(0, ho, a_row, None)

    def b_row(r, carry):
        acc = _conv_rows(mid_ref[r], mid_ref[r + 1], mid_ref[r + 2], wb_ref, wo)
        res = sc_ref[r].astype(jnp.float32)
        o_ref[r + 1, pl.ds(1, wo), :] = jnp.maximum(
            acc + bb_ref[...] + res, 0.0).astype(o_ref.dtype)
        return carry

    lax.fori_loop(0, ho, b_row, None)


def _pool_linear_kernel(x_ref, w_ref, b_ref, o_ref):
    """Global average pool (padding border is zero) + classifier matmul."""
    hp, wp, _ = x_ref.shape
    inv = 1.0 / float((hp - 2) * (wp - 2))
    xs = x_ref[...].astype(jnp.float32)
    feat = jnp.sum(jnp.sum(xs, axis=0), axis=0, keepdims=True) * inv  # (1, C)
    o_ref[...] = jnp.dot(feat, w_ref[...],
                         preferred_element_type=jnp.float32) + b_ref[...]


# ----------------------------- pallas_call wrappers -------------------------

def _act_spec(shape):
    _, hp, wp, c = shape
    return pl.BlockSpec((None, hp, wp, c), lambda bi: (bi, 0, 0, 0))


def _w_spec():
    return pl.BlockSpec((3, 3 * C_PAD, C_PAD), lambda bi: (0, 0, 0))


def _b_spec():
    return pl.BlockSpec((1, C_PAD), lambda bi: (0, 0))


def conv1_call(xp, w, b):
    n, hp, wp, c = xp.shape
    return pl.pallas_call(
        _conv1_kernel,
        grid=(n,),
        in_specs=[_act_spec(xp.shape), _w_spec(), _b_spec()],
        out_specs=_act_spec(xp.shape),
        out_shape=jax.ShapeDtypeStruct((n, hp, wp, c), jnp.bfloat16),
        compiler_params=_COMPILER_PARAMS,
    )(xp, w, b)


def identity_block_call(xp, wa, ba, wb, bb):
    n, hp, wp, c = xp.shape
    return pl.pallas_call(
        _block_id_kernel,
        grid=(n,),
        in_specs=[_act_spec(xp.shape),
                  _w_spec(), _b_spec(), _w_spec(), _b_spec()],
        out_specs=_act_spec(xp.shape),
        out_shape=jax.ShapeDtypeStruct((n, hp, wp, c), jnp.bfloat16),
        scratch_shapes=[pltpu.VMEM((hp, wp, c), jnp.bfloat16)],
        compiler_params=_COMPILER_PARAMS,
    )(xp, wa, ba, wb, bb)


def downsample_block_call(xp, wa, ba, wb, bb, cin, planes):
    n, hp, wp, c = xp.shape
    h, w = hp - 2, wp - 2
    assert h % 2 == 0 and w % 2 == 0, "stride-2 block needs even spatial dims"
    ho, wo = h // 2, w // 2
    # spatial parity planes of the padded input
    pee = xp[:, 0::2, 0::2, :]
    peo = xp[:, 0::2, 1::2, :]
    poe = xp[:, 1::2, 0::2, :]
    poo = xp[:, 1::2, 1::2, :]
    # option-'A' shortcut: x[:, ::2, ::2] + planes//4 zero channels per side
    # (mirrors the reference LambdaLayer; valid for planes == 2 * cin configs).
    sc = xp[:, 1:h + 1:2, 1:w + 1:2, :cin]
    sc = jnp.pad(sc, ((0, 0), (0, 0), (0, 0),
                      (planes // 4, c - cin - planes // 4)))
    plane_spec = pl.BlockSpec((None, ho + 1, wo + 1, c),
                              lambda bi: (bi, 0, 0, 0))
    sc_spec = pl.BlockSpec((None, ho, wo, c), lambda bi: (bi, 0, 0, 0))
    out_spec = pl.BlockSpec((None, ho + 2, wo + 2, c),
                            lambda bi: (bi, 0, 0, 0))
    return pl.pallas_call(
        _block_down_kernel,
        grid=(n,),
        in_specs=[plane_spec, plane_spec, plane_spec, plane_spec, sc_spec,
                  _w_spec(), _b_spec(), _w_spec(), _b_spec()],
        out_specs=out_spec,
        out_shape=jax.ShapeDtypeStruct((n, ho + 2, wo + 2, c), jnp.bfloat16),
        scratch_shapes=[pltpu.VMEM((ho + 2, wo + 2, c), jnp.bfloat16)],
        compiler_params=_COMPILER_PARAMS,
    )(pee, peo, poe, poo, sc, wa, ba, wb, bb)


def pool_linear_call(xp, w, b):
    n, hp, wp, c = xp.shape
    ncp = w.shape[1]
    out = pl.pallas_call(
        _pool_linear_kernel,
        grid=(n,),
        in_specs=[_act_spec(xp.shape),
                  pl.BlockSpec((c, ncp), lambda bi: (0, 0)),
                  pl.BlockSpec((1, ncp), lambda bi: (0, 0))],
        out_specs=pl.BlockSpec((None, 1, ncp), lambda bi: (bi, 0, 0)),
        out_shape=jax.ShapeDtypeStruct((n, 1, ncp), jnp.float32),
        compiler_params=_COMPILER_PARAMS,
    )(xp, w, b)
    return out.reshape(n, ncp)


# ------------------------------- JAX glue -----------------------------------

def _prep_conv(cp, alpha=1.0):
    """Fold eval-mode BN (and rezero alpha) into the conv weight / bias and
    repack into the kernel's lane-dense (3, 3*C_PAD, C_PAD) bf16 layout."""
    w4d = cp["w"]                                  # (3, 3, cin, cout) f32
    cin, cout = w4d.shape[2], w4d.shape[3]
    inv_std = lax.rsqrt(cp["var"] + _BN_EPS)
    scale = cp["gamma"] * inv_std                  # (cout,)
    bias = (cp["beta"] - cp["mean"] * scale) * alpha
    w = w4d * (scale * alpha)
    w = jnp.pad(w, ((0, 0), (0, 0), (0, C_PAD - cin), (0, C_PAD - cout)))
    # group by kernel column j; stack kernel rows i along the input channels
    wcat = jnp.transpose(w, (1, 0, 2, 3)).reshape(3, 3 * C_PAD, C_PAD)
    bias = jnp.pad(bias, (0, C_PAD - cout)).reshape(1, C_PAD)
    return wcat.astype(jnp.bfloat16), bias.astype(jnp.float32)


def resnet_forward(params, x_nchw):
    num_classes = params["linear_w"].shape[1]
    x = jnp.transpose(x_nchw, (0, 2, 3, 1)).astype(jnp.float32)      # NHWC
    c = x.shape[-1]
    # spatial pad by 1 (conv padding) + channel pad to 128 lanes, cast to bf16
    xp = jnp.pad(x, ((0, 0), (1, 1), (1, 1),
                     (0, C_PAD - c))).astype(jnp.bfloat16)

    w1, b1 = _prep_conv(params["conv1"])
    xp = conv1_call(xp, w1, b1)

    in_planes = 16
    for layer in params["layers"]:
        for blk in layer:
            planes = blk["conv_a"]["w"].shape[3]
            stride = blk["stride"]
            wa, ba = _prep_conv(blk["conv_a"])
            wb, bb = _prep_conv(blk["conv_b"], alpha=blk["alpha"])
            if stride == 1 and in_planes == planes:
                xp = identity_block_call(xp, wa, ba, wb, bb)
            else:
                xp = downsample_block_call(xp, wa, ba, wb, bb,
                                           in_planes, planes)
            in_planes = planes

    lw = jnp.pad(params["linear_w"].astype(jnp.float32),
                 ((0, C_PAD - params["linear_w"].shape[0]),
                  (0, C_PAD - num_classes)))
    lb = jnp.pad(params["linear_b"].astype(jnp.float32).reshape(1, -1),
                 ((0, 0), (0, C_PAD - num_classes)))
    logits = pool_linear_call(xp, lw, lb)
    return logits[:, :num_classes]


# ---------------------------- parameter init --------------------------------

def init_params(key, channels=3, num_classes=10, num_blocks=(1, 1, 1),
                rezero=False):
    n_convs = 1 + 2 * sum(num_blocks)
    keys = iter(jax.random.split(key, n_convs + 2))

    def conv_bn(cin, cout):
        fan_in = cin * 9
        std = (2.0 / fan_in) ** 0.5                 # kaiming_normal_
        return {
            "w": jax.random.normal(next(keys), (3, 3, cin, cout),
                                   jnp.float32) * std,
            "gamma": jnp.ones((cout,), jnp.float32),
            "beta": jnp.zeros((cout,), jnp.float32),
            "mean": jnp.zeros((cout,), jnp.float32),
            "var": jnp.ones((cout,), jnp.float32),
        }

    params = {"conv1": conv_bn(channels, 16)}
    in_planes = 16
    layers = []
    for planes, nb, first_stride in ((16, num_blocks[0], 1),
                                     (32, num_blocks[1], 2),
                                     (64, num_blocks[2], 2)):
        strides = [first_stride] + [1] * (nb - 1)
        layer = []
        for s in strides:
            layer.append({
                "stride": s,
                "conv_a": conv_bn(in_planes, planes),
                "conv_b": conv_bn(planes, planes),
                "alpha": (jnp.zeros((), jnp.float32) if rezero
                          else jnp.ones((), jnp.float32)),
            })
            in_planes = planes
        layers.append(layer)
    params["layers"] = layers
    # Linear(64, num_classes): kaiming_normal_ weight, default uniform bias
    kw, kb = next(keys), next(keys)
    std = (2.0 / 64) ** 0.5
    params["linear_w"] = jax.random.normal(kw, (64, num_classes),
                                           jnp.float32) * std
    bound = 1.0 / (64.0 ** 0.5)
    params["linear_b"] = jax.random.uniform(kb, (num_classes,), jnp.float32,
                                            minval=-bound, maxval=bound)
    return params


# --------------------------------- main --------------------------------------

if __name__ == "__main__":
    key = jax.random.PRNGKey(0)
    pkey, xkey = jax.random.split(key)
    params = init_params(pkey, channels=3, num_classes=10,
                         num_blocks=(1, 1, 1), rezero=False)
    x = jax.random.normal(xkey, (2, 3, 16, 16), jnp.float32)  # NCHW like PyTorch
    out = resnet_forward(params, x)
    jax.block_until_ready(out)
    assert out.shape == (2, 10) and out.dtype == jnp.float32
    print("KERNEL_OK")
</pallas_src>

<mosaic_0001>
module attributes {stable_mosaic.version = 11 : i64} {
  func.func @_conv1_kernel(%arg0: i32, %arg1: memref<1x18x18x128xbf16, #tpu.memory_space<vmem>>, %arg2: memref<3x384x128xbf16, #tpu.memory_space<vmem>>, %arg3: memref<1x128xf32, #tpu.memory_space<vmem>>, %arg4: memref<1x18x18x128xbf16, #tpu.memory_space<vmem>>) attributes {dimension_semantics = [#tpu.dimension_semantics<parallel>], iteration_bounds = array<i64: 2>, scalar_prefetch = 0 : i64, scratch_operands = 0 : i64, tpu.core_type = #tpu.core_type<tc>, window_params = [{transform_indices = @transform_0, window_bounds = array<i64: 1, 18, 18, 128>}, {pipeline_mode = #tpu.pipeline_mode<synchronous>, transform_indices = @transform_1, window_bounds = array<i64: 3, 384, 128>}, {pipeline_mode = #tpu.pipeline_mode<synchronous>, transform_indices = @transform_2, window_bounds = array<i64: 1, 128>}, {transform_indices = @transform_3, window_bounds = array<i64: 1, 18, 18, 128>}]} {
    %cst = arith.constant 0.000000e+00 : bf16
    %0 = vector.broadcast %cst : bf16 to vector<18x18x128xbf16>
    %c0 = arith.constant 0 : index
    %c0_0 = arith.constant 0 : index
    %c0_1 = arith.constant 0 : index
    %c0_2 = arith.constant 0 : index
    %1 = vector.load %arg4[%c0, %c0_0, %c0_1, %c0_2] : memref<1x18x18x128xbf16, #tpu.memory_space<vmem>>, vector<1x18x18x128xbf16>
    %2 = vector.shape_cast %1 : vector<1x18x18x128xbf16> to vector<18x18x128xbf16>
    %3 = vector.shape_cast %0 : vector<18x18x128xbf16> to vector<1x18x18x128xbf16>
    tpu.vector_store %arg4[%c0, %c0_0, %c0_1, %c0_2], %3 {strides = array<i32>} : memref<1x18x18x128xbf16, #tpu.memory_space<vmem>>, vector<1x18x18x128xbf16>,
    %c0_i32 = arith.constant 0 : i32
    %c16_i32 = arith.constant 16 : i32
    %4 = arith.addi %c0_i32, %c16_i32 : i32
    %c1_i32 = arith.constant 1 : i32
    scf.for %arg5 = %c0_i32 to %4 step %c1_i32  : i32 {
      %c0_4 = arith.constant 0 : index
      %5 = arith.index_cast %arg5 : i32 to index
      %c0_5 = arith.constant 0 : index
      %c0_6 = arith.constant 0 : index
      %6 = vector.load %arg1[%c0_4, %5, %c0_5, %c0_6] : memref<1x18x18x128xbf16, #tpu.memory_space<vmem>>, vector<1x1x18x128xbf16>
      %7 = vector.shape_cast %6 : vector<1x1x18x128xbf16> to vector<18x128xbf16>
      %c1_i32_7 = arith.constant 1 : i32
      %8 = arith.addi %arg5, %c1_i32_7 : i32
      %c0_8 = arith.constant 0 : index
      %9 = arith.index_cast %8 : i32 to index
      %c0_9 = arith.constant 0 : index
      %c0_10 = arith.constant 0 : index
      %10 = vector.load %arg1[%c0_8, %9, %c0_9, %c0_10] : memref<1x18x18x128xbf16, #tpu.memory_space<vmem>>, vector<1x1x18x128xbf16>
      %11 = vector.shape_cast %10 : vector<1x1x18x128xbf16> to vector<18x128xbf16>
      %c2_i32 = arith.constant 2 : i32
      %12 = arith.addi %arg5, %c2_i32 : i32
      %c0_11 = arith.constant 0 : index
      %13 = arith.index_cast %12 : i32 to index
      %c0_12 = arith.constant 0 : index
      %c0_13 = arith.constant 0 : index
      %14 = vector.load %arg1[%c0_11, %13, %c0_12, %c0_13] : memref<1x18x18x128xbf16, #tpu.memory_space<vmem>>, vector<1x1x18x128xbf16>
      %15 = vector.shape_cast %14 : vector<1x1x18x128xbf16> to vector<18x128xbf16>
      %16 = tpu.concatenate %7, %11, %15 in 1 : vector<18x128xbf16>, vector<18x128xbf16>, vector<18x128xbf16> -> vector<18x384xbf16>
      %17 = vector.extract_strided_slice %16 {offsets = [0, 0], sizes = [16, 384], strides = [1, 1]} : vector<18x384xbf16> to vector<16x384xbf16>
      %c0_14 = arith.constant 0 : index
      %c0_15 = arith.constant 0 : index
      %c0_16 = arith.constant 0 : index
      %18 = vector.load %arg2[%c0_14, %c0_15, %c0_16] : memref<3x384x128xbf16, #tpu.memory_space<vmem>>, vector<1x384x128xbf16>
      %19 = vector.shape_cast %18 : vector<1x384x128xbf16> to vector<384x128xbf16>
      %cst_17 = arith.constant dense<0.000000e+00> : vector<16x128xf32>
      %20 = tpu.matmul %17, %19, %cst_17 {dimension_numbers = #tpu.dot_dimension_numbers<[1], [0], [0], [1], [0, 0, 1, 1], [], []>} : vector<16x384xbf16>, vector<384x128xbf16>, vector<16x128xf32> -> vector<16x128xf32>
      %21 = vector.extract_strided_slice %16 {offsets = [1, 0], sizes = [16, 384], strides = [1, 1]} : vector<18x384xbf16> to vector<16x384xbf16>
      %c1 = arith.constant 1 : index
      %c0_18 = arith.constant 0 : index
      %c0_19 = arith.constant 0 : index
      %22 = vector.load %arg2[%c1, %c0_18, %c0_19] : memref<3x384x128xbf16, #tpu.memory_space<vmem>>, vector<1x384x128xbf16>
      %23 = vector.shape_cast %22 : vector<1x384x128xbf16> to vector<384x128xbf16>
      %cst_20 = arith.constant dense<0.000000e+00> : vector<16x128xf32>
      %24 = tpu.matmul %21, %23, %cst_20 {dimension_numbers = #tpu.dot_dimension_numbers<[1], [0], [0], [1], [0, 0, 1, 1], [], []>} : vector<16x384xbf16>, vector<384x128xbf16>, vector<16x128xf32> -> vector<16x128xf32>
      %25 = arith.addf %20, %24 : vector<16x128xf32>
      %26 = vector.extract_strided_slice %16 {offsets = [2, 0], sizes = [16, 384], strides = [1, 1]} : vector<18x384xbf16> to vector<16x384xbf16>
      %c2 = arith.constant 2 : index
      %c0_21 = arith.constant 0 : index
      %c0_22 = arith.constant 0 : index
      %27 = vector.load %arg2[%c2, %c0_21, %c0_22] : memref<3x384x128xbf16, #tpu.memory_space<vmem>>, vector<1x384x128xbf16>
      %28 = vector.shape_cast %27 : vector<1x384x128xbf16> to vector<384x128xbf16>
      %cst_23 = arith.constant dense<0.000000e+00> : vector<16x128xf32>
      %29 = tpu.matmul %26, %28, %cst_23 {dimension_numbers = #tpu.dot_dimension_numbers<[1], [0], [0], [1], [0, 0, 1, 1], [], []>} : vector<16x384xbf16>, vector<384x128xbf16>, vector<16x128xf32> -> vector<16x128xf32>
      %30 = arith.addf %25, %29 : vector<16x128xf32>
      %c0_24 = arith.constant 0 : index
      %c0_25 = arith.constant 0 : index
      %31 = vector.load %arg3[%c0_24, %c0_25] : memref<1x128xf32, #tpu.memory_space<vmem>>, vector<1x128xf32>
      %32 = vector.broadcast %31 : vector<1x128xf32> to vector<16x128xf32>
      %33 = arith.addf %30, %32 : vector<16x128xf32>
      %cst_26 = arith.constant 0.000000e+00 : f32
      %34 = vector.broadcast %cst_26 : f32 to vector<16x128xf32>
      %35 = arith.maximumf %33, %34 : vector<16x128xf32>
      %36 = arith.truncf %35 : vector<16x128xf32> to vector<16x128xbf16>
      %c1_i32_27 = arith.constant 1 : i32
      %37 = arith.addi %arg5, %c1_i32_27 : i32
      %c0_28 = arith.constant 0 : index
      %38 = arith.index_cast %37 : i32 to index
      %c1_29 = arith.constant 1 : index
      %c0_30 = arith.constant 0 : index
      %39 = vector.load %arg4[%c0_28, %38, %c1_29, %c0_30] : memref<1x18x18x128xbf16, #tpu.memory_space<vmem>>, vector<1x1x16x128xbf16>
      %40 = vector.shape_cast %39 : vector<1x1x16x128xbf16> to vector<16x128xbf16>
      %41 = vector.shape_cast %36 : vector<16x128xbf16> to vector<1x1x16x128xbf16>
      tpu.vector_store %arg4[%c0_28, %38, %c1_29, %c0_30], %41 {strides = array<i32>} : memref<1x18x18x128xbf16, #tpu.memory_space<vmem>>, vector<1x1x16x128xbf16>,
    }
    %c16_i32_3 = arith.constant 16 : i32
    return
  }
  func.func @transform_0(%arg0: i32) -> (i32, i32, i32, i32) {
    %c0_i32 = arith.constant 0 : i32
    %c0_i32_0 = arith.constant 0 : i32
    %c0_i32_1 = arith.constant 0 : i32
    %c0_i32_2 = arith.constant 0 : i32
    return %arg0, %c0_i32, %c0_i32_0, %c0_i32_1 : i32, i32, i32, i32
  }
  func.func @transform_1(%arg0: i32) -> (i32, i32, i32) {
    %c0_i32 = arith.constant 0 : i32
    %c0_i32_0 = arith.constant 0 : i32
    %c0_i32_1 = arith.constant 0 : i32
    %c0_i32_2 = arith.constant 0 : i32
    return %c0_i32, %c0_i32_0, %c0_i32_1 : i32, i32, i32
  }
  func.func @transform_2(%arg0: i32) -> (i32, i32) {
    %c0_i32 = arith.constant 0 : i32
    %c0_i32_0 = arith.constant 0 : i32
    %c0_i32_1 = arith.constant 0 : i32
    return %c0_i32, %c0_i32_0 : i32, i32
  }
  func.func @transform_3(%arg0: i32) -> (i32, i32, i32, i32) {
    %c0_i32 = arith.constant 0 : i32
    %c0_i32_0 = arith.constant 0 : i32
    %c0_i32_1 = arith.constant 0 : i32
    %c0_i32_2 = arith.constant 0 : i32
    return %arg0, %c0_i32, %c0_i32_0, %c0_i32_1 : i32, i32, i32, i32
  }
}

</mosaic_0001>

<bundles_post_ra>
// kernel: tpu_custom_call.1
= control target key start
LH: loop header
LB: loop body
LE: loop exit
PB: predicated region body
PF: predicated region fallthrough
CT: control target
= control target key end

     0   :  { %s1774_s12 = smov 0   ;;  %s2147_s0 = inlined_call_operand.vmem [shape: bf16[2,18,18,128], index: 0, kind: input, shape index: {}]   ;;  %s2148_s1 = inlined_call_operand.vmem [shape: bf16[3,384,128], index: 1, kind: input, shape index: {}]   ;;  %s2149_s2 = inlined_call_operand.vmem [shape: f32[1,128], index: 2, kind: input, shape index: {}]   ;;  %s2150_s3 = inlined_call_operand.vmem [shape: bf16[2,18,18,128], index: 3, kind: output, shape index: {}]  }
   0x1 LB: > { %s1283_s13 = sadd.s32 4294967295, %s1745_s12   ;;  %p1287_p0 = scmp.ge.s32.totalorder %s1745_s12, 1  ;;  %s1745_s12 = sphi %s1774_s12, %s13_s12  }
   0x2   : > { %p137_p1 = scmp.lt.s32.totalorder %s1745_s12, 3 }
   0x4   : > { %p138_p2 = pnand %p1287_p0, %p137_p1 }
   0x5   : > { %p161_p3 = scmp.lt.s32.totalorder (!%p138_p2), %s1283_s13, 1  ;;  %v1751_v0 = vmov (!%p138_p2), 0   ;;  %s1846_s21 = smov (!%p138_p2), 0  }
   0x6   : > { %141 = sbr.rel (%p138_p2) target bundleno = 376 (0x178), region = 32 }
   0xd   : > { %s2152_s13 = smov (!%p161_p3, %s1283_s13), 1 }
   0xe   : > { %s1637_s14 = smul.u32 216, %s2152_s13 }
  0x10   : > { %s1785_s17 = scalar_lea.vmem %s2147_s0, %s1637_s14  ;;  %s1790_s20 = scalar_lea.vmem %s2150_s3, %s1637_s14 }
  0x11   : > { %172 = vst [vmem:[%s1790_s20] sm:$0xf] %v1751_v0  ;;  %173 = vst [vmem:[%s1790_s20 + $0x4] sm:$0xf] %v1751_v0 }
  0x12   : > { %174 = vst [vmem:[%s1790_s20 + $0x8] sm:$0x1] %v1751_v0  ;;  %175 = vst [vmem:[%s1790_s20 + $0xc] sm:$0xf] %v1751_v0 }
  0x13   : > { %176 = vst [vmem:[%s1790_s20 + $0x10] sm:$0xf] %v1751_v0  ;;  %177 = vst [vmem:[%s1790_s20 + $0x14] sm:$0x1] %v1751_v0 }
  0x14   : > { %178 = vst [vmem:[%s1790_s20 + $0x18] sm:$0xf] %v1751_v0  ;;  %179 = vst [vmem:[%s1790_s20 + $0x1c] sm:$0xf] %v1751_v0 }
  0x15   : > { %180 = vst [vmem:[%s1790_s20 + $0x20] sm:$0x1] %v1751_v0  ;;  %181 = vst [vmem:[%s1790_s20 + $0x24] sm:$0xf] %v1751_v0 }
  0x16   : > { %182 = vst [vmem:[%s1790_s20 + $0x28] sm:$0xf] %v1751_v0  ;;  %183 = vst [vmem:[%s1790_s20 + $0x2c] sm:$0x1] %v1751_v0 }
  0x17   : > { %184 = vst [vmem:[%s1790_s20 + $0x30] sm:$0xf] %v1751_v0  ;;  %185 = vst [vmem:[%s1790_s20 + $0x34] sm:$0xf] %v1751_v0 }
  0x18   : > { %186 = vst [vmem:[%s1790_s20 + $0x38] sm:$0x1] %v1751_v0  ;;  %187 = vst [vmem:[%s1790_s20 + $0x3c] sm:$0xf] %v1751_v0 }
  0x19   : > { %188 = vst [vmem:[%s1790_s20 + $0x40] sm:$0xf] %v1751_v0  ;;  %189 = vst [vmem:[%s1790_s20 + $0x44] sm:$0x1] %v1751_v0 }
  0x1a   : > { %190 = vst [vmem:[%s1790_s20 + $0x48] sm:$0xf] %v1751_v0  ;;  %191 = vst [vmem:[%s1790_s20 + $0x4c] sm:$0xf] %v1751_v0 }
  0x1b   : > { %192 = vst [vmem:[%s1790_s20 + $0x50] sm:$0x1] %v1751_v0  ;;  %193 = vst [vmem:[%s1790_s20 + $0x54] sm:$0xf] %v1751_v0 }
  0x1c   : > { %194 = vst [vmem:[%s1790_s20 + $0x58] sm:$0xf] %v1751_v0  ;;  %195 = vst [vmem:[%s1790_s20 + $0x5c] sm:$0x1] %v1751_v0 }
  0x1d   : > { %196 = vst [vmem:[%s1790_s20 + $0x60] sm:$0xf] %v1751_v0  ;;  %197 = vst [vmem:[%s1790_s20 + $0x64] sm:$0xf] %v1751_v0 }
  0x1e   : > { %198 = vst [vmem:[%s1790_s20 + $0x68] sm:$0x1] %v1751_v0  ;;  %199 = vst [vmem:[%s1790_s20 + $0x6c] sm:$0xf] %v1751_v0 }
  0x1f   : > { %200 = vst [vmem:[%s1790_s20 + $0x70] sm:$0xf] %v1751_v0  ;;  %201 = vst [vmem:[%s1790_s20 + $0x74] sm:$0x1] %v1751_v0 }
  0x20   : > { %202 = vst [vmem:[%s1790_s20 + $0x78] sm:$0xf] %v1751_v0  ;;  %203 = vst [vmem:[%s1790_s20 + $0x7c] sm:$0xf] %v1751_v0 }
  0x21   : > { %204 = vst [vmem:[%s1790_s20 + $0x80] sm:$0x1] %v1751_v0  ;;  %205 = vst [vmem:[%s1790_s20 + $0x84] sm:$0xf] %v1751_v0 }
  0x22   : > { %206 = vst [vmem:[%s1790_s20 + $0x88] sm:$0xf] %v1751_v0  ;;  %207 = vst [vmem:[%s1790_s20 + $0x8c] sm:$0x1] %v1751_v0 }
  0x23   : > { %208 = vst [vmem:[%s1790_s20 + $0x90] sm:$0xf] %v1751_v0  ;;  %209 = vst [vmem:[%s1790_s20 + $0x94] sm:$0xf] %v1751_v0 }
  0x24   : > { %210 = vst [vmem:[%s1790_s20 + $0x98] sm:$0x1] %v1751_v0  ;;  %211 = vst [vmem:[%s1790_s20 + $0x9c] sm:$0xf] %v1751_v0 }
  0x25   : > { %212 = vst [vmem:[%s1790_s20 + $0xa0] sm:$0xf] %v1751_v0  ;;  %213 = vst [vmem:[%s1790_s20 + $0xa4] sm:$0x1] %v1751_v0 }
  0x26   : > { %214 = vst [vmem:[%s1790_s20 + $0xa8] sm:$0xf] %v1751_v0  ;;  %215 = vst [vmem:[%s1790_s20 + $0xac] sm:$0xf] %v1751_v0 }
  0x27   : > { %216 = vst [vmem:[%s1790_s20 + $0xb0] sm:$0x1] %v1751_v0  ;;  %217 = vst [vmem:[%s1790_s20 + $0xb4] sm:$0xf] %v1751_v0 }
  0x28   : > { %218 = vst [vmem:[%s1790_s20 + $0xb8] sm:$0xf] %v1751_v0  ;;  %219 = vst [vmem:[%s1790_s20 + $0xbc] sm:$0x1] %v1751_v0 }
  0x29   : > { %220 = vst [vmem:[%s1790_s20 + $0xc0] sm:$0xf] %v1751_v0  ;;  %221 = vst [vmem:[%s1790_s20 + $0xc4] sm:$0xf] %v1751_v0 }
  0x2a   : > { %222 = vst [vmem:[%s1790_s20 + $0xc8] sm:$0x1] %v1751_v0  ;;  %223 = vst [vmem:[%s1790_s20 + $0xcc] sm:$0xf] %v1751_v0 }
  0x2b   : > { %224 = vst [vmem:[%s1790_s20 + $0xd0] sm:$0xf] %v1751_v0  ;;  %225 = vst [vmem:[%s1790_s20 + $0xd4] sm:$0x1] %v1751_v0 }
  0x2c LB: >> { %v1657_v1 = vld [vmem:[%s2148_s1 + $0x100] sm:$0xff]   ;;  %v1752_v2 = vmov 0.0   ;;  %vm1753_vm0 = vmmov 0   ;;  %v1660_v5 = vld [vmem:[%s2148_s1 + $0x108] sm:$0xff]   ;;  %v1663_v8 = vld [vmem:[%s2148_s1 + $0x110] sm:$0xff]   ;;  %s1481_s6 = smul.u32 12, %s1749_s21  ;;  %s1749_s21 = sphi %s1846_s21, %s231_s21  }
  0x2d   : >> { %1577 = vmatprep.subr.bf16.mxu1 %v1752_v2  ;;  %v1658_v3 = vld [vmem:[%s2148_s1 + $0xc0] sm:$0xff]   ;;  %1484 = vmatprep.subr.bf16.mxu0 %v1657_v1  ;;  %v1661_v6 = vld [vmem:[%s2148_s1 + $0xc8] sm:$0xff]   ;;  %v1664_v9 = vld [vmem:[%s2148_s1 + $0xd0] sm:$0xff]   ;;  %vm376_vm1 = vsmask.f32 7424  ;;  %vm917_vm2 = vcmask 1046528  }
  0x2e   : >> { %v1659_v4 = vld [vmem:[%s2148_s1 + $0x140] sm:$0xff]   ;;  %1593 = vmatprep.mubr.msk.bf16.mxu1 %vm1753_vm0, %v1752_v2  ;;  %1485 = vmatpush3.bf16.msra.mxu0 %v1658_v3  ;;  %v1662_v7 = vld [vmem:[%s2148_s1 + $0x148] sm:$0xff]   ;;  %v1665_v10 = vld [vmem:[%s2148_s1 + $0x150] sm:$0xff]   ;;  %s234_s16 = scalar_lea.vmem %s1785_s17, %s1481_s6  ;;  %s1252_s10 = scalar_lea.vmem %s1790_s20, %s1481_s6  ;;  %vm1200_vm3 = vcmask 1043456   ;;  %vm1201_vm4 = vsmask.f32 7938 }
  0x2f   : >> { %1578 = vmatpush3.bf16.msra.mxu1 %v1659_v4  ;;  %1486 = vmatprep.subr.bf16.mxu0 %v1660_v5  ;;  %v1666_v11 = vld [vmem:[%s2148_s1 + $0x118] sm:$0xff]   ;;  %v1669_v14 = vld [vmem:[%s2148_s1 + $0x120] sm:$0xff]   ;;  %v1672_v17 = vld [vmem:[%s2148_s1 + $0x128] sm:$0xff]   ;;  %vm1175_vm5 = vsmask.f32 256  ;;  %vm1207_vm7 = vcmask 1040384  }
  0x30   : >> { %1579 = vmatprep.subr.bf16.mxu1 %v1752_v2  ;;  %v1667_v12 = vld [vmem:[%s2148_s1 + $0xd8] sm:$0xff]   ;;  %v1670_v15 = vld [vmem:[%s2148_s1 + $0xe0] sm:$0xff]   ;;  %v1673_v18 = vld [vmem:[%s2148_s1 + $0xe8] sm:$0xff]   ;;  %vm1176_vm6 = vsmask.f32 4368  ;;  %s231_s21 = sadd.s32 1, %s1749_s21  }
  0x31   : >> { %v1668_v13 = vld [vmem:[%s2148_s1 + $0x158] sm:$0xff]   ;;  %v1671_v16 = vld [vmem:[%s2148_s1 + $0x160] sm:$0xff]   ;;  %v1674_v19 = vld [vmem:[%s2148_s1 + $0x168] sm:$0xff]   ;;  %p228_p4 = scmp.ge.s32.totalorder %s231_s21, 16  }
  0x32   : >> { %1487 = vmatpush3.bf16.msra.mxu0 %v1661_v6  ;;  %v1675_v20 = vld [vmem:[%s2148_s1 + $0x130] sm:$0xff]   ;;  %v1678_v23 = vld [vmem:[%s2148_s1 + $0x138] sm:$0xff]   ;;  %v1943_v31 = vld [vmem:[%s234_s16] sm:$0xff]  }
  0x33   : >> { %1580 = vmatpush3.bf16.msra.mxu1 %v1662_v7  ;;  %1488 = vmatprep.subr.bf16.mxu0 %v1663_v8  ;;  %v1676_v21 = vld [vmem:[%s2148_s1 + $0xf0] sm:$0xff]   ;;  %v1679_v24 = vld [vmem:[%s2148_s1 + $0xf8] sm:$0xff]   ;;  %v1684_v32 = vld [vmem:[%s234_s16 + $0x8] ss:$0 sps:$4 sm:$0x11]   ;;  %v378_v36 = vshrl.u32 %v1943_v31, 16 }
  0x34   : >> { %1581 = vmatprep.subr.bf16.mxu1 %v1752_v2  ;;  %v1677_v22 = vld [vmem:[%s2148_s1 + $0x170] sm:$0xff]   ;;  %v1680_v27 = vld [vmem:[%s2148_s1 + $0x178] sm:$0xff]   ;;  %v1685_v33 = vld [vmem:[%s2148_s1 + $0x40] sm:$0xff]   ;;  %v380_v37 = vshll.u32 %v1943_v31, 16  ;;  %v385_v38 = vshll.u32 %v1684_v32, 16  ;;  %v918_v59 = vrot.slane %v1943_v31, 1 }
  0x35   : >> { %v1933_v25 = vld [vmem:[%s234_s16 + $0xc] sm:$0xff]   ;;  %v1935_v26 = vld [vmem:[%s234_s16 + $0x14] ss:$0 sps:$4 sm:$0x11]   ;;  %v1951_v39 = vld [vmem:[%s234_s16 + $0x18] sm:$0xff]   ;;  %v919_v60 = vrot.slane %v1684_v32, 1 }
  0x36   : >> { %1489 = vmatpush3.bf16.msra.mxu0 %v1664_v9  ;;  %v390_v28 = vshrl.u32 %v1933_v25, 16  ;;  %v392_v29 = vshll.u32 %v1933_v25, 16  ;;  %v397_v30 = vshll.u32 %v1935_v26, 16  ;;  %v382_v41 = vrot.slane %v380_v37, 1  ;;  %v1688_v49 = vld [vmem:[%s2148_s1] sm:$0xff]   ;;  %v1690_v51 = vld [vmem:[%s2148_s1 + $0x48] sm:$0xff]   ;;  %vm1202_vm8 = vmand %vm1200_vm3, %vm1201_vm4 }
  0x37   : >> { %1582 = vmatpush3.bf16.msra.mxu1 %v1665_v10  ;;  %1490 = vmatprep.subr.bf16.mxu0 %v1666_v11  ;;  %v1687_v42 = vld [vmem:[%s234_s16 + $0x20] ss:$0 sps:$4 sm:$0x11]   ;;  %v387_v43 = vrot.slane %v385_v38, 1  ;;  %v402_v44 = vshrl.u32 %v1951_v39, 16  ;;  %v404_v45 = vshll.u32 %v1951_v39, 16  ;;  %v1987_v0 = vsel %vm917_vm2, %v918_v59, %v919_v60  ;;  %vm1177_vm9 = vmor %vm1175_vm5, %vm1176_vm6 }
  0x38   : >> { %1583 = vmatprep.subr.bf16.mxu1 %v1752_v2  ;;  %v394_v34 = vrot.slane %v392_v29, 1  ;;  %v399_v35 = vrot.slane %v397_v30, 1  ;;  %v383_v47 = vor.u32 %v382_v41, %v378_v36  ;;  %v409_v48 = vshll.u32 %v1687_v42, 16  ;;  %v1689_v55 = vld [vmem:[%s2148_s1 + $0x80] sm:$0xff]   ;;  %v1691_v56 = vld [vmem:[%s2148_s1 + $0x8] sm:$0xff]   ;;  %v1693_v58 = vld [vmem:[%s2148_s1 + $0x50] sm:$0xff]  }
  0x39   : >> { %v406_v50 = vrot.slane %v404_v45, 1  ;;  %v1692_v61 = vld [vmem:[%s2148_s1 + $0x88] sm:$0xff]   ;;  %v924_v62 = vrot.slane %v1951_v39, 1  ;;  %v1694_v63 = vld [vmem:[%s2148_s1 + $0x10] sm:$0xff]   ;;  %v925_v1 = vrot.slane %v1687_v42, 1  ;;  %v1696_v3 = vld [vmem:[%s2148_s1 + $0x58] sm:$0xff]  }
  0x3a   : >> { %1491 = vmatpush3.bf16.msra.mxu0 %v1667_v12  ;;  %v395_v40 = vor.u32 %v394_v34, %v390_v28  ;;  %v388_v52 = vsel %vm376_vm1, %v383_v47, %v387_v43  ;;  %v411_v53 = vrot.slane %v409_v48, 1  ;;  %v1695_v5 = vld [vmem:[%s2148_s1 + $0x90] sm:$0xff]   ;;  %v1697_v6 = vld [vmem:[%s2148_s1 + $0x18] sm:$0xff]   ;;  %v1699_v7 = vld [vmem:[%s2148_s1 + $0x60] sm:$0xff]  }
  0x3b   : >> { %1584 = vmatpush3.bf16.msra.mxu1 %v1668_v13  ;;  %1492 = vmatprep.subr.bf16.mxu0 %v1669_v14  ;;  %v407_v54 = vor.u32 %v406_v50, %v402_v44  ;;  %v1993_v4 = vsel %vm917_vm2, %v924_v62, %v925_v1  ;;  %v1698_v8 = vld [vmem:[%s2148_s1 + $0x98] sm:$0xff]   ;;  %v1700_v9 = vld [vmem:[%s2148_s1 + $0x20] sm:$0xff]   ;;  %v1702_v10 = vld [vmem:[%s2148_s1 + $0x68] sm:$0xff]  }
  0x3c   : >> { %1585 = vmatprep.subr.bf16.mxu1 %v1752_v2  ;;  %v400_v46 = vsel %vm376_vm1, %v395_v40, %v399_v35  ;;  %v1701_v11 = vld [vmem:[%s2148_s1 + $0xa0] sm:$0xff]   ;;  %v1703_v12 = vld [vmem:[%s2148_s1 + $0x28] sm:$0xff]   ;;  %v1705_v13 = vld [vmem:[%s2148_s1 + $0x70] sm:$0xff]  }
  0x3d   : >> { %592 = vmatprep.mubr.bf16.mxu0 %v400_v46  ;;  %v412_v57 = vsel %vm376_vm1, %v407_v54, %v411_v53  ;;  %v1704_v14 = vld [vmem:[%s2148_s1 + $0xa8] sm:$0xff]   ;;  %v1717_v28 = vld [vmem:[%s2148_s1 + $0x1d0] sm:$0xff]   ;;  %v1723_v34 = vld [vmem:[%s2148_s1 + $0x1e0] sm:$0xff]  }
  0x3e   : >> { %1493 = vmatpush3.bf16.msra.mxu0 %v1670_v15  ;;  %v1706_v15 = vld [vmem:[%s2148_s1 + $0x30] sm:$0xff]   ;;  %v1716_v29 = vld [vmem:[%s2148_s1 + $0x208] sm:$0xff]   ;;  %v1722_v35 = vld [vmem:[%s2148_s1 + $0x218] sm:$0xff]  }
  0x3f   : >> { %1586 = vmatpush3.bf16.msra.mxu1 %v1671_v16  ;;  %1494 = vmatprep.subr.bf16.mxu0 %v1672_v17  ;;  %v1708_v16 = vld [vmem:[%s2148_s1 + $0x78] sm:$0xff]   ;;  %v1707_v17 = vld [vmem:[%s2148_s1 + $0xb0] sm:$0xff]   ;;  %v1724_v36 = vld [vmem:[%s2148_s1 + $0x1a0] sm:$0xff]  }
  0x40   : >> { %1587 = vmatprep.subr.bf16.mxu1 %v1752_v2  ;;  %v1718_v30 = vld [vmem:[%s2148_s1 + $0x190] sm:$0xff]   ;;  %v1726_v37 = vld [vmem:[%s2148_s1 + $0x1e8] sm:$0xff]   ;;  %v1725_v38 = vld [vmem:[%s2148_s1 + $0x220] sm:$0xff]  }
  0x41   : >> { %v1719_v32 = vld [vmem:[%s2148_s1 + $0x210] sm:$0xff]   ;;  %v1728_v41 = vld [vmem:[%s2148_s1 + $0x228] sm:$0xff]   ;;  %v1732_v43 = vld [vmem:[%s2148_s1 + $0x1f8] sm:$0xff]  }
  0x42   : >> { %1495 = vmatpush3.bf16.msra.mxu0 %v1673_v18  ;;  %v1709_v18 = vld [vmem:[%s2148_s1 + $0x38] sm:$0xff]   ;;  %v1729_v40 = vld [vmem:[%s2148_s1 + $0x1f0] sm:$0xff]   ;;  %vm1208_vm10 = vmand %vm1207_vm7, %vm1175_vm5 }
  0x43   : >> { %1588 = vmatpush3.bf16.msra.mxu1 %v1674_v19  ;;  %1496 = vmatprep.subr.bf16.mxu0 %v1675_v20  ;;  %v1711_v19 = vld [vmem:[%s2148_s1 + $0x1c0] sm:$0xff]   ;;  %v921_v20 = vrot.slane %v1933_v25, 1  ;;  %v1730_v42 = vld [vmem:[%s2148_s1 + $0x1b0] sm:$0xff]   ;;  %v1733_v45 = vld [vmem:[%s2148_s1 + $0x1b8] sm:$0xff]  }
  0x44   : >> { %1589 = vmatprep.subr.bf16.mxu1 %v1752_v2  ;;  %v1731_v44 = vld [vmem:[%s2148_s1 + $0x230] sm:$0xff]   ;;  %v1734_v46 = vld [vmem:[%s2148_s1 + $0x238] sm:$0xff]  }
  0x46   : >> { %1497 = vmatpush3.bf16.msra.mxu0 %v1676_v21  ;;  %v922_v21 = vrot.slane %v1935_v26, 1  ;;  %v1713_v26 = vld [vmem:[%s2148_s1 + $0x200] sm:$0xff]  }
  0x47   : >> { %1590 = vmatpush3.bf16.msra.mxu1 %v1677_v22  ;;  %1498 = vmatprep.subr.bf16.mxu0 %v1678_v23  ;;  %v1710_v22 = vld [vmem:[%s2148_s1 + $0xb8] sm:$0xff]   ;;  %v1712_v23 = vld [vmem:[%s2148_s1 + $0x180] sm:$0xff]  }
  0x48   : >> { %1591 = vmatprep.subr.bf16.mxu1 %v1752_v2 }
  0x4a   : >> { %1499 = vmatpush3.bf16.msra.mxu0 %v1679_v24  ;;  %v1714_v24 = vld [vmem:[%s2148_s1 + $0x1c8] sm:$0xff]  }
  0x4b   : >> { %1592 = vmatpush3.bf16.msra.mxu1 %v1680_v27  ;;  %1515 = vmatprep.subr.bf16.mxu0 %v1685_v33  ;;  %v1715_v27 = vld [vmem:[%s2148_s1 + $0x188] sm:$0xff]   ;;  %v1721_v33 = vld [vmem:[%s2148_s1 + $0x198] sm:$0xff]  }
  0x4c   : >> { %1597 = vmatprep.subr.bf16.mxu1 %v1752_v2 }
  0x4d   : >> { %593 = vmatmul.mubr.bf16.vlgmr.msra.gmra.mrb[0].mxu0 %v388_v52 }
  0x4e   : >> { %1516 = vmatpush3.bf16.msra.mxu0 %v1688_v49  ;;  %818 = vmatprep.mubr.bf16.mxu0 %v1933_v25  ;;  %v923_v25 = vsel %vm917_vm2, %v921_v20, %v922_v21 }
  0x4f   : >> { %1517 = vmatprep.subr.bf16.mxu0 %v1690_v51  ;;  %1594 = vmatmul.mubr.bf16.vlgmr.msra.gmra.mrb[0].mxu1 %v412_v57 }
  0x50   : >> { %1598 = vmatpush3.bf16.msra.mxu1 %v1689_v55  ;;  %1613 = vmatprep.mubr.msk.bf16.mxu1 %vm1753_vm0, %v1752_v2 }
  0x51   : >> { %1599 = vmatprep.subr.bf16.mxu1 %v1752_v2 }
  0x52   : >> { %1518 = vmatpush3.bf16.msra.mxu0 %v1691_v56 }
  0x53   : >> { %1519 = vmatprep.subr.bf16.mxu0 %v1693_v58 }
  0x54   : >> { %1600 = vmatpush3.bf16.msra.mxu1 %v1692_v61 }
  0x55   : >> { %1601 = vmatprep.subr.bf16.mxu1 %v1752_v2 }
  0x56   : >> { %1520 = vmatpush3.bf16.msra.mxu0 %v1694_v63 }
  0x57   : >> { %1521 = vmatprep.subr.bf16.mxu0 %v1696_v3 }
  0x58   : >> { %1602 = vmatpush3.bf16.msra.mxu1 %v1695_v5 }
  0x59   : >> { %1603 = vmatprep.subr.bf16.mxu1 %v1752_v2 }
  0x5a   : >> { %1522 = vmatpush3.bf16.msra.mxu0 %v1697_v6 }
  0x5b   : >> { %1523 = vmatprep.subr.bf16.mxu0 %v1699_v7 }
  0x5c   : >> { %1604 = vmatpush3.bf16.msra.mxu1 %v1698_v8 }
  0x5d   : >> { %1605 = vmatprep.subr.bf16.mxu1 %v1752_v2 }
  0x5e   : >> { %1524 = vmatpush3.bf16.msra.mxu0 %v1700_v9 }
  0x5f   : >> { %1525 = vmatprep.subr.bf16.mxu0 %v1702_v10 }
  0x60   : >> { %1606 = vmatpush3.bf16.msra.mxu1 %v1701_v11 }
  0x61   : >> { %1607 = vmatprep.subr.bf16.mxu1 %v1752_v2 }
  0x62   : >> { %1526 = vmatpush3.bf16.msra.mxu0 %v1703_v12 }
  0x63   : >> { %1527 = vmatprep.subr.bf16.mxu0 %v1705_v13 }
  0x64   : >> { %1608 = vmatpush3.bf16.msra.mxu1 %v1704_v14 }
  0x65   : >> { %1609 = vmatprep.subr.bf16.mxu1 %v1752_v2 }
  0x66   : >> { %1528 = vmatpush3.bf16.msra.mxu0 %v1706_v15 }
  0x67   : >> { %1529 = vmatprep.subr.bf16.mxu0 %v1708_v16 }
  0x68   : >> { %1610 = vmatpush3.bf16.msra.mxu1 %v1707_v17 }
  0x69   : >> { %1611 = vmatprep.subr.bf16.mxu1 %v1752_v2 }
  0x6a   : >> { %1530 = vmatpush3.bf16.msra.mxu0 %v1709_v18  ;;  %v1471_v18 = vld [vmem:[%s2149_s2] ss:$0 sm:$0xff] }
  0x6b   : >> { %1546 = vmatprep.subr.bf16.mxu0 %v1711_v19 }
  0x6c   : >> { %1612 = vmatpush3.bf16.msra.mxu1 %v1710_v22 }
  0x6d   : >> { %819 = vmatmul.mubr.bf16.vlgmr.msra.gmra.mrb[4].mxu0 %v1943_v31  ;;  %1617 = vmatprep.subr.bf16.mxu1 %v1752_v2  ;;  %v1720_v31 = vld [vmem:[%s2148_s1 + $0x1d8] sm:$0xff]  }
  0x6e   : >> { %1547 = vmatpush3.bf16.msra.mxu0 %v1712_v23  ;;  %1106 = vmatprep.mubr.bf16.mxu0 %v923_v25 }
  0x6f   : >> { %1548 = vmatprep.subr.bf16.mxu0 %v1714_v24  ;;  %1614 = vmatmul.mubr.bf16.vlgmr.msra.gmra.mrb[4].mxu1 %v1951_v39  ;;  %v1727_v39 = vld [vmem:[%s2148_s1 + $0x1a8] sm:$0xff]  }
  0x70   : >> { %1618 = vmatpush3.bf16.msra.mxu1 %v1713_v26  ;;  %1633 = vmatprep.mubr.msk.bf16.mxu1 %vm1753_vm0, %v1752_v2 }
  0x71   : >> { %1619 = vmatprep.subr.bf16.mxu1 %v1752_v2 }
  0x72   : >> { %1549 = vmatpush3.bf16.msra.mxu0 %v1715_v27 }
  0x73   : >> { %1550 = vmatprep.subr.bf16.mxu0 %v1717_v28 }
  0x74   : >> { %1620 = vmatpush3.bf16.msra.mxu1 %v1716_v29 }
  0x75   : >> { %1621 = vmatprep.subr.bf16.mxu1 %v1752_v2 }
  0x76   : >> { %1551 = vmatpush3.bf16.msra.mxu0 %v1718_v30 }
  0x77   : >> { %1552 = vmatprep.subr.bf16.mxu0 %v1720_v31 }
  0x78   : >> { %1622 = vmatpush3.bf16.msra.mxu1 %v1719_v32 }
  0x79   : >> { %1623 = vmatprep.subr.bf16.mxu1 %v1752_v2 }
  0x7a   : >> { %1553 = vmatpush3.bf16.msra.mxu0 %v1721_v33 }
  0x7b   : >> { %1554 = vmatprep.subr.bf16.mxu0 %v1723_v34  ;;  %v1474_v34 = vld [vmem:[%s1252_s10 + $0xc] sm:$0xf] }
  0x7c   : >> { %1624 = vmatpush3.bf16.msra.mxu1 %v1722_v35 }
  0x7d   : >> { %1625 = vmatprep.subr.bf16.mxu1 %v1752_v2 }
  0x7e   : >> { %1555 = vmatpush3.bf16.msra.mxu0 %v1724_v36 }
  0x7f   : >> { %1556 = vmatprep.subr.bf16.mxu0 %v1726_v37 }
  0x80   : >> { %1626 = vmatpush3.bf16.msra.mxu1 %v1725_v38  ;;  %v1477_v38 = vld [vmem:[%s1252_s10 + $0x14] sm:$0x1] }
  0x81   : >> { %1627 = vmatprep.subr.bf16.mxu1 %v1752_v2 }
  0x82   : >> { %1557 = vmatpush3.bf16.msra.mxu0 %v1727_v39 }
  0x83   : >> { %1558 = vmatprep.subr.bf16.mxu0 %v1729_v40 }
  0x84   : >> { %1628 = vmatpush3.bf16.msra.mxu1 %v1728_v41 }
  0x85   : >> { %1629 = vmatprep.subr.bf16.mxu1 %v1752_v2 }
  0x86   : >> { %1559 = vmatpush3.bf16.msra.mxu0 %v1730_v42 }
  0x87   : >> { %1560 = vmatprep.subr.bf16.mxu0 %v1732_v43 }
  0x88   : >> { %1630 = vmatpush3.bf16.msra.mxu1 %v1731_v44 }
  0x89   : >> { %1631 = vmatprep.subr.bf16.mxu1 %v1752_v2 }
  0x8a   : >> { %1561 = vmatpush3.bf16.msra.mxu0 %v1733_v45 }
  0x8c   : >> { %1632 = vmatpush3.bf16.msra.mxu1 %v1734_v46 }
  0x8d   : >> { %1107 = vmatmul.mubr.bf16.vlgmr.msra.gmra.mrb[8].mxu0 %v1987_v0 }
  0x8f   : >> { %1634 = vmatmul.mubr.bf16.vlgmr.msra.gmra.mrb[8].mxu1 %v1993_v4 }
 0x120   : >> { %v1500_v47 = vpop.f32.mrb[0].mxu0 }
 0x121   : >> { %v1501_v48 = vpop.f32.mrb[1].mxu0 }
 0x122   : >> { %v1502_v49 = vadd.f32 %v1501_v48, %v1500_v47  ;;  %v1503_v50 = vpop.f32.mrb[2].mxu0  ;;  %v635_v51 = vpop.f32.mrb[0].mxu1 }
 0x123   : >> { %v1504_v52 = vpop.f32.mrb[3].mxu0  ;;  %v1595_v54 = vpop.f32.mrb[1].mxu1 }
 0x124   : >> { %v636_v53 = vadd.f32 %v1502_v49, %v635_v51  ;;  %v1505_v55 = vadd.f32 %v1504_v52, %v1503_v50  ;;  %v638_v56 = vpop.f32.mrb[2].mxu1 }
 0x125   : >> { %v1596_v58 = vpop.f32.mrb[3].mxu1 }
 0x126   : >> { %v639_v57 = vadd.f32 %v1505_v55, %v638_v56 }
 0x140   : >> { %v1531_v59 = vpop.f32.mrb[4].mxu0 }
 0x141   : >> { %v1532_v2 = vpop.f32.mrb[5].mxu0 }
 0x142   : >> { %v1533_v60 = vadd.f32 %v1532_v2, %v1531_v59  ;;  %v1534_v61 = vpop.f32.mrb[6].mxu0  ;;  %v861_v62 = vpop.f32.mrb[4].mxu1 }
 0x143   : >> { %v1535_v63 = vpop.f32.mrb[7].mxu0  ;;  %v1615_v1 = vpop.f32.mrb[5].mxu1 }
 0x144   : >> { %v821_v0 = vadd.f32 %v1533_v60, %v636_v53  ;;  %v1536_v3 = vadd.f32 %v1535_v63, %v1534_v61  ;;  %v864_v4 = vpop.f32.mrb[6].mxu1 }
 0x145   : >> { %v1616_v7 = vpop.f32.mrb[7].mxu1 }
 0x146   : >> { %v862_v5 = vadd.f32 %v861_v62, %v821_v0  ;;  %v824_v6 = vadd.f32 %v1536_v3, %v639_v57 }
 0x148   : >> { %v865_v8 = vadd.f32 %v864_v4, %v824_v6 }
 0x160   : >> { %v1562_v9 = vpop.f32.mrb[8].mxu0 }
 0x161   : >> { %v1563_v10 = vpop.f32.mrb[9].mxu0 }
 0x162   : >> { %v1564_v11 = vadd.f32 %v1563_v10, %v1562_v9  ;;  %v1565_v12 = vpop.f32.mrb[10].mxu0  ;;  %v1149_v13 = vpop.f32.mrb[8].mxu1 }
 0x163   : >> { %v1566_v14 = vpop.f32.mrb[11].mxu0  ;;  %v1635_v16 = vpop.f32.mrb[9].mxu1 }
 0x164   : >> { %v1150_v15 = vadd.f32 %v1564_v11, %v1149_v13  ;;  %v1567_v17 = vadd.f32 %v1566_v14, %v1565_v12  ;;  %v1152_v19 = vpop.f32.mrb[10].mxu1 }
 0x165   : >> { %v1636_v22 = vpop.f32.mrb[11].mxu1 }
 0x166   : >> { %v1156_v20 = vadd.f32 %v1150_v15, %v862_v5  ;;  %v1153_v21 = vadd.f32 %v1567_v17, %v1152_v19 }
 0x168   : >> { %v1165_v23 = vadd.f32 %v1471_v18, %v1156_v20  ;;  %v1157_v24 = vadd.f32 %v1153_v21, %v865_v8 }
 0x16a   : >> { %v1167_v25 = vmax.f32 %v1165_v23, 0.0  ;;  %v1166_v26 = vadd.f32 %v1471_v18, %v1157_v24 }
 0x16c   : >> { %v1482_v27 = vpack.c.bf16 %v1167_v25, %v1167_v25  ;;  %v1168_v28 = vmax.f32 %v1166_v26, 0.0 }
 0x16e   : >> { %v1179_v29 = vshrl.u32 %v1482_v27, 16  ;;  %v1483_v30 = vpack.c.bf16 %v1168_v28, %v1168_v28  ;;  %v1182_v32 = vshll.u32 %v1482_v27, 16 }
 0x170   : >> { %v1181_v31 = vrot.slane %v1179_v29, 7  ;;  %v1187_v33 = vshrl.u32 %v1483_v30, 16  ;;  %v1190_v37 = vshll.u32 %v1483_v30, 16 }
 0x171   : > { %230 = sbr.rel (!%p228_p4) target bundleno = 44 (0x2c), region = 75 }
 0x172   : >> { %v1184_v35 = vor.u32 %v1182_v32, %v1181_v31  ;;  %v1189_v36 = vrot.slane %v1187_v33, 7  ;;  %v1185_v39 = vrot.slane %v1181_v31, 4 }
 0x174   : >> { %v1204_v40 = vsel %vm1202_vm8, %v1184_v35, %v1474_v34  ;;  %v1192_v41 = vor.u32 %v1190_v37, %v1189_v36  ;;  %v1194_v42 = vrot.slane %v1189_v36, 4 }
 0x175   : >> { %1475 = vst [vmem:[%s1252_s10 + $0xc] sm:$0xf] %v1204_v40 }
 0x176   : >> { %v1193_v43 = vsel %vm1177_vm9, %v1185_v39, %v1192_v41  ;;  %v1210_v44 = vsel %vm1208_vm10, %v1194_v42, %v1477_v38 }
 0x177   : >> { %1476 = vst [vmem:[%s1252_s10 + $0x10] sm:$0xf] %v1193_v43  ;;  %1478 = vst [vmem:[%s1252_s10 + $0x14] sm:$0x1] %v1210_v44 }
 0x178 PF: > { %s13_s12 = sadd.s32 1, %s1745_s12  }
 0x179   : > { %p10_p5 = scmp.ge.s32.totalorder %s13_s12, 4  }
 0x17b   :  { %12 = sbr.rel (!%p10_p5) target bundleno = 1 (0x1), region = 86 }

</bundles_post_ra>
